<compile_context>
chip_gen: v6e
topology: v6e:2x2x1
jax: 0.10.0
libtpu: 0.0.40
codegen_flags: <defaults>
</compile_context>

<pallas_src>
import functools

import jax
import jax.numpy as jnp
from jax.experimental import pallas as pl
from jax.experimental.pallas import tpu as pltpu


_LANE_CANDIDATES = (4096, 2048, 1024, 512, 256, 128)


def _tpu_generation():
    try:
        kind = jax.devices()[0].device_kind.lower()
    except Exception:
        return "unknown"
    for tag in ("v7", "v6", "v5"):
        if tag in kind:
            return tag
    return "unknown"


def _gen_params(gen):
    """(target bytes / input stream / block, vmem_limit_bytes, want 2-TC split)."""
    if gen == "v7":
        return 6 << 20, 48 << 20, True    # 2 in x 2 bufs x 6 MiB = 24 MiB < 48
    if gen == "v6":
        return 8 << 20, 64 << 20, False   # 32 MiB of 128 MiB physical
    if gen == "v5":
        return 2 << 20, 32 << 20, False   # keep steps small, raise scoped limit
    return 2 << 20, 32 << 20, False


def _pick_lane(n_total):
    for lane in _LANE_CANDIDATES:
        if n_total % lane == 0:
            return lane, False
    return 512, True          # fallback: zero-pad flat arrays up to a multiple


def _pick_tile_rows(rows_total, lane, itemsize, target_bytes, sub, want_multicore):
    """Row-tile <= target_bytes/stream, sublane-aligned, best-effort even split."""
    max_rows = max(sub, (target_bytes // (lane * itemsize)) // sub * sub)
    tile_rows = min(max_rows, rows_total)
    if tile_rows < rows_total:
        tile_rows = max(sub, (tile_rows // sub) * sub)
    if want_multicore and rows_total > sub:
        nb = pl.cdiv(rows_total, tile_rows)
        while (nb < 2 or nb % 2) and tile_rows > sub:
            tile_rows = max(sub, (tile_rows // 2) // sub * sub)
            nb = pl.cdiv(rows_total, tile_rows)
    return tile_rows


def _content_loss_kernel(x_ref, t_ref, psum_ref, *, rows_total, tile_rows, ragged):
    # Squared differences for this (tile_rows, LANE) block, accumulated in f32.
    d = x_ref[...].astype(jnp.float32) - t_ref[...].astype(jnp.float32)
    sq = d * d
    if ragged:
        # Mask rows past the true extent (only the last cdiv block is partial).
        row0 = pl.program_id(0) * tile_rows
        rows = row0 + jax.lax.broadcasted_iota(jnp.int32, sq.shape, 0)
        sq = jnp.where(rows < rows_total, sq, 0.0)
    # Per-lane partial sum -> lane-dense (1, LANE) store, no cross-lane reduce.
    psum_ref[0] = jnp.sum(sq, axis=0, keepdims=True)


def content_loss(x, target):
    """Returns (passthrough_output, mse_loss_scalar).

    x, target: arrays of identical shape/dtype (e.g. NCHW feature maps).
    The pass-through output is `x` itself (no kernel copy), matching the
    PyTorch module which returns its input unchanged.
    """
    assert x.shape == target.shape, "input/target shapes must match"
    n_total = 1
    for s in x.shape:
        n_total *= int(s)
    itemsize = jnp.dtype(x.dtype).itemsize
    sub = {4: 8, 2: 16, 1: 32}.get(itemsize, 8)

    lane, needs_pad = _pick_lane(n_total)
    rows_total = pl.cdiv(n_total, lane)
    padded_total = rows_total * lane

    x_flat = x.reshape(-1)
    t_flat = target.reshape(-1)
    if needs_pad:
        # Zero-padding BOTH operands contributes 0 to the squared-diff sum.
        pad = padded_total - n_total
        x_flat = jnp.pad(x_flat, (0, pad))
        t_flat = jnp.pad(t_flat, (0, pad))
    x2 = x_flat.reshape(rows_total, lane)
    t2 = t_flat.reshape(rows_total, lane)

    gen = _tpu_generation()
    target_bytes, vmem_limit, want_multicore = _gen_params(gen)
    tile_rows = _pick_tile_rows(rows_total, lane, itemsize, target_bytes, sub,
                                want_multicore)
    num_blocks = pl.cdiv(rows_total, tile_rows)
    ragged = (rows_total % tile_rows) != 0

    kernel = functools.partial(
        _content_loss_kernel,
        rows_total=rows_total, tile_rows=tile_rows, ragged=ragged)

    bytes_accessed = 2 * n_total * itemsize + num_blocks * lane * 4
    psums = pl.pallas_call(
        kernel,
        grid_spec=pltpu.PrefetchScalarGridSpec(
            num_scalar_prefetch=0,
            grid=(num_blocks,),
            in_specs=[
                pl.BlockSpec((tile_rows, lane), lambda i: (i, 0)),
                pl.BlockSpec((tile_rows, lane), lambda i: (i, 0)),
            ],
            out_specs=pl.BlockSpec((1, 1, lane), lambda i: (i, 0, 0)),
        ),
        out_shape=jax.ShapeDtypeStruct((num_blocks, 1, lane), jnp.float32),
        compiler_params=pltpu.CompilerParams(
            dimension_semantics=("parallel",),
            vmem_limit_bytes=vmem_limit,
        ),
        cost_estimate=pl.CostEstimate(
            flops=3 * n_total,
            transcendentals=0,
            bytes_accessed=bytes_accessed,
        ),
    )(x2, t2)

    loss = jnp.sum(psums) / jnp.float32(n_total)
    # Identity pass-through: return the original input, no copy through the kernel.
    return x, loss


if __name__ == "__main__":
    key = jax.random.PRNGKey(0)
    k_in, k_tgt = jax.random.split(key)

    # NCHW, small shapes consistent with a conv-feature-map input
    N, C, H, W = 2, 4, 16, 16
    x = jax.random.normal(k_in, (N, C, H, W), dtype=jnp.float32)
    target = jax.random.normal(k_tgt, (N, C, H, W), dtype=jnp.float32)

    out, loss = content_loss(x, target)
    out = jax.block_until_ready(out)
    loss = jax.block_until_ready(loss)

    # reference check (pure JAX)
    ref_loss = jnp.mean((x - target) ** 2)
    assert jnp.allclose(out, x), "pass-through output mismatch"
    assert jnp.allclose(loss, ref_loss, rtol=1e-5, atol=1e-6), (
        f"loss mismatch: {loss} vs {ref_loss}"
    )

    print("KERNEL_OK")
</pallas_src>

<mosaic_0001>
module attributes {stable_mosaic.version = 11 : i64} {
  func.func @_content_loss_kernel(%arg0: i32, %arg1: memref<1x2048xf32, #tpu.memory_space<vmem>>, %arg2: memref<1x2048xf32, #tpu.memory_space<vmem>>, %arg3: memref<1x1x2048xf32, #tpu.memory_space<vmem>>) attributes {dimension_semantics = [#tpu.dimension_semantics<parallel>], iteration_bounds = array<i64: 1>, scalar_prefetch = 0 : i64, scratch_operands = 0 : i64, tpu.core_type = #tpu.core_type<tc>, window_params = [{transform_indices = @transform_0, window_bounds = array<i64: 1, 2048>}, {transform_indices = @transform_1, window_bounds = array<i64: 1, 2048>}, {transform_indices = @transform_2, window_bounds = array<i64: 1, 1, 2048>}]} {
    %c0 = arith.constant 0 : index
    %c0_0 = arith.constant 0 : index
    %0 = vector.load %arg1[%c0, %c0_0] : memref<1x2048xf32, #tpu.memory_space<vmem>>, vector<1x2048xf32>
    %c0_1 = arith.constant 0 : index
    %c0_2 = arith.constant 0 : index
    %1 = vector.load %arg2[%c0_1, %c0_2] : memref<1x2048xf32, #tpu.memory_space<vmem>>, vector<1x2048xf32>
    %2 = arith.subf %0, %1 : vector<1x2048xf32>
    %3 = arith.mulf %2, %2 : vector<1x2048xf32>
    %cst = arith.constant dense<0.000000e+00> : vector<2048xf32>
    %4 = vector.multi_reduction <add>, %3, %cst [0] : vector<1x2048xf32> to vector<2048xf32>
    %5 = vector.shape_cast %4 : vector<2048xf32> to vector<1x2048xf32>
    %c0_3 = arith.constant 0 : index
    %c0_4 = arith.constant 0 : index
    %c0_5 = arith.constant 0 : index
    %6 = vector.load %arg3[%c0_3, %c0_4, %c0_5] : memref<1x1x2048xf32, #tpu.memory_space<vmem>>, vector<1x1x2048xf32>
    %7 = vector.shape_cast %6 : vector<1x1x2048xf32> to vector<1x2048xf32>
    %8 = vector.shape_cast %5 : vector<1x2048xf32> to vector<1x1x2048xf32>
    tpu.vector_store %arg3[%c0_3, %c0_4, %c0_5], %8 {strides = array<i32>} : memref<1x1x2048xf32, #tpu.memory_space<vmem>>, vector<1x1x2048xf32>,
    return
  }
  func.func @transform_0(%arg0: i32) -> (i32, i32) {
    %c0_i32 = arith.constant 0 : i32
    %c0_i32_0 = arith.constant 0 : i32
    return %arg0, %c0_i32 : i32, i32
  }
  func.func @transform_1(%arg0: i32) -> (i32, i32) {
    %c0_i32 = arith.constant 0 : i32
    %c0_i32_0 = arith.constant 0 : i32
    return %arg0, %c0_i32 : i32, i32
  }
  func.func @transform_2(%arg0: i32) -> (i32, i32, i32) {
    %c0_i32 = arith.constant 0 : i32
    %c0_i32_0 = arith.constant 0 : i32
    %c0_i32_1 = arith.constant 0 : i32
    return %arg0, %c0_i32, %c0_i32_0 : i32, i32, i32
  }
}

</mosaic_0001>

<bundles_post_ra>
// kernel: tpu_custom_call.1
= control target key start
LH: loop header
LB: loop body
LE: loop exit
PB: predicated region body
PF: predicated region fallthrough
CT: control target
= control target key end

     0   :  { %7 = vsyncpa [#allocation3], 0  ;;  %s160_s0 = inlined_call_operand.hbm [shape: f32[1,2048], index: 0, kind: input, shape index: {}]   ;;  %s161_s1 = inlined_call_operand.hbm [shape: f32[1,2048], index: 1, kind: input, shape index: {}]   ;;  %s162_s2 = inlined_call_operand.hbm [shape: f32[1,1,2048], index: 2, kind: output, shape index: {}]  }
   0x1   :  { %8 = vsyncpa [#allocation6], 0 }
   0x2   :  { %9 = vsyncpa [#allocation4], 0  ;;  %s133_s9 = smov [#allocation2]   ;;  %s134_s11 = smov [#allocation5]  }
   0x3   :  { %s16_s10 = sshll.u32 %s133_s9, 4  ;;  %s26_s12 = sshll.u32 %s134_s11, 4  ;;  %s17_s10 = int_to_ptr.vmem [resolvable:$true] %s16_s10  ;;  %s27_s12 = int_to_ptr.vmem [resolvable:$true] %s26_s12 }
   0x4   :  { %s75_s13 = scalar_lea.vmem %s17_s10, 256  ;;  %p80_p1 = scmp.lt.s32.totalorder %s17_s10, %s17_s10 }
   0x5   :  { %p76_p0 = scmp.ne.s32.totalorder %s17_s10, %s75_s13  ;;  %p81_p2 = scmp.lt.s32.totalorder %s75_s13, %s75_s13 }
   0x7   :  { %p82_p3 = por %p81_p2, %p80_p1 }
   0x9   :  { %p83_p4 = pnand %p82_p3, %p76_p0 }
   0xb   :  { %86 = shalt.err (!%p83_p4)
}
   0xc   :  { %19 = dma.hbm_to_vmem [thread:$0]  %s160_s0, 256, %s17_s10, [#allocation3]  }
   0xd   :  { %s95_s16 = scalar_lea.vmem %s27_s12, 256  ;;  %p100_p6 = scmp.lt.s32.totalorder %s27_s12, %s27_s12 }
   0xe   :  { %p96_p5 = scmp.ne.s32.totalorder %s27_s12, %s95_s16  ;;  %p101_p7 = scmp.lt.s32.totalorder %s95_s16, %s95_s16 }
  0x10   :  { %p102_p8 = por %p101_p7, %p100_p6 }
  0x12   :  { %p103_p9 = pnand %p102_p8, %p96_p5 }
  0x14   :  { %106 = shalt.err (!%p103_p9)
}
  0x15   :  { %29 = dma.hbm_to_vmem [thread:$0]  %s161_s1, 256, %s27_s12, [#allocation6]  }
  0x16   :  { %127 = dma.done.wait [#allocation3], 256  }
  0x17   :  { %128 = vsyncadd [#allocation3], 4294967040 }
  0x18   :  { %129 = dma.done.wait [#allocation6], 256  }
  0x19   :  { %130 = vsyncadd [#allocation6], 4294967040  ;;  %v36_v0 = vld [vmem:[#allocation2] sm:$0xff]  ;;  %v38_v1 = vld [vmem:[#allocation5] sm:$0xff]  ;;  %s135_s0 = smov [#allocation7]  }
  0x1a   :  { %v37_v2 = vld [vmem:[#allocation2 + $0x8] sm:$0xff]  ;;  %v40_v3 = vsub.f32 %v36_v0, %v38_v1  ;;  %v39_v4 = vld [vmem:[#allocation5 + $0x8] sm:$0xff]  ;;  %s54_s19 = sshll.u32 %s135_s0, 4  ;;  %s55_s19 = int_to_ptr.vmem [resolvable:$true] %s54_s19 }
  0x1b   :  { %v41_v5 = vsub.f32 %v37_v2, %v39_v4  ;;  %s107_s20 = scalar_lea.vmem %s55_s19, 256  ;;  %p112_p11 = scmp.lt.s32.totalorder %s55_s19, %s55_s19 }
  0x1c   :  { %v42_v6 = vmul.f32 %v40_v3, %v40_v3  ;;  %p108_p10 = scmp.ne.s32.totalorder %s55_s19, %s107_s20  ;;  %p113_p12 = scmp.lt.s32.totalorder %s107_s20, %s107_s20 }
  0x1d   :  { %v43_v7 = vmul.f32 %v41_v5, %v41_v5 }
  0x1e   :  { %46 = vst [vmem:[#allocation7] sm:$0xff] %v42_v6  ;;  %p114_p13 = por %p113_p12, %p112_p11 }
  0x1f   :  { %47 = vst [vmem:[#allocation7 + $0x8] sm:$0xff] %v43_v7 }
  0x20   :  { %p115_p0 = pnand %p114_p13, %p108_p10 }
  0x22   :  { %118 = shalt.err (!%p115_p0)
}
  0x23   :  { %57 = dma.vmem_to_hbm [thread:$0]  %s55_s19, 256, %s162_s2, [#allocation4]  }
  0x24   :  { %131 = dma.done.wait [#allocation4], 256  }
  0x25   :  { %132 = vsyncadd [#allocation4], 4294967040 }
  0x26   :  { %61 = vsyncpa [#allocation3], 1 }
  0x27   :  { %62 = vsyncpa [#allocation6], 1 }
  0x28   :  { %63 = vsyncpa [#allocation4], 1 }

</bundles_post_ra>
